<compile_context>
chip_gen: v6e
topology: v6e:2x2x1
jax: 0.10.0
libtpu: 0.0.40
codegen_flags: <defaults>
</compile_context>

<pallas_src>
import functools

import jax
import jax.numpy as jnp
import numpy as np
from jax.experimental import pallas as pl
from jax.experimental.pallas import tpu as pltpu


def _cdiv(a, b):
    return -(-a // b)


def _device_caps():
    """(per-block byte cap, vmem_limit_bytes) sized for the TPU generation."""
    kind = ""
    try:
        kind = jax.devices()[0].device_kind.lower()
    except Exception:
        pass
    if ("v5" in kind) or ("v6" in kind):
        # 128 MiB physical VMEM: bigger blocks amortize the ~0.35 us/step cost.
        return 14 * 1024 * 1024, 96 * 1024 * 1024
    # v7x (64 MiB VMEM per TC) and unknown chips: stay conservative.
    return 7 * 1024 * 1024, 48 * 1024 * 1024


def _pick_tile(hw, c_pad, itemsize, max_bytes):
    """Largest multiple-of-128 lane tile that fits the per-block VMEM budget."""
    per_lane = c_pad * itemsize + 8 * 4        # preds rows + sublane-padded label row
    cap = max(128, (max_bytes // per_lane) // 128 * 128)
    hw_cap = max(128, (hw // 128) * 128)       # never exceed the array lane extent
    return int(min(cap, hw_cap))


def _dice_kernel(labels_ref, preds_ref, tp_ref, cnt_ref, ps_ref, *, hw, nt_per):
    s = pl.program_id(1)
    t = pl.program_id(2)

    @pl.when(t == 0)
    def _init():
        tp_ref[...] = jnp.zeros_like(tp_ref)
        cnt_ref[...] = jnp.zeros_like(cnt_ref)
        ps_ref[...] = jnp.zeros_like(ps_ref)

    C, T = preds_ref.shape
    n_chunks = T // 128

    tile_idx = s * nt_per + t          # logical tile index (may overrun; masked below)
    base = tile_idx * T                # first spatial position covered by this tile

    lane = jax.lax.broadcasted_iota(jnp.int32, (1, 128), 1)
    cls = jax.lax.broadcasted_iota(jnp.int32, (C, 128), 0)

    def body(j, carry):
        tp, cnt, ps = carry
        off = pl.multiple_of(j * 128, 128)
        p = preds_ref[:, pl.ds(off, 128)].astype(jnp.float32)     # (C, 128)
        lab = labels_ref[:, pl.ds(off, 128)].astype(jnp.int32)    # (1, 128)
        valid = (base + off + lane) < hw                          # ragged-tail mask
        p = jnp.where(valid, p, 0.0)
        match = jnp.logical_and(lab == cls, valid)                # in-register one-hot
        tp = tp + jnp.where(match, p, 0.0)
        cnt = cnt + match.astype(jnp.float32)
        ps = ps + p
        return tp, cnt, ps

    zero = jnp.zeros((C, 128), jnp.float32)
    tp, cnt, ps = jax.lax.fori_loop(0, n_chunks, body, (zero, zero, zero))

    tp_ref[...] += tp
    cnt_ref[...] += cnt
    ps_ref[...] += ps


def _dice_loss_impl(preds, labels, *, delta=0.5):
    """preds: (B, C, H, W) float; labels: (B, H, W) int. Returns scalar loss."""
    B, C, H, W = preds.shape
    HW = H * W

    preds = preds.reshape(B, C, HW)            # spatial -> lane axis (free reshape)
    labels = labels.reshape(B, 1, HW)
    if labels.dtype != jnp.int32:
        labels = labels.astype(jnp.int32)

    if HW < 128:                               # tiny input: pad once (negligible cost)
        pad = 128 - HW
        preds = jnp.pad(preds, ((0, 0), (0, 0), (0, pad)))
        labels = jnp.pad(labels, ((0, 0), (0, 0), (0, pad)), constant_values=C)
        HW_arr = 128
    else:
        HW_arr = HW

    c_pad = _cdiv(C, 8) * 8
    itemsize = jnp.dtype(preds.dtype).itemsize
    block_cap, vmem_limit = _device_caps()
    T = _pick_tile(HW_arr, c_pad, itemsize, block_cap)
    nt_tot = _cdiv(HW_arr, T)
    S = 2 if (B == 1 and nt_tot >= 2) else 1   # v7x: keep both TCs busy when B == 1
    nt_per = _cdiv(nt_tot, S)

    def data_idx(b, s, t):
        # Clamp so a fully-out-of-range split tile still maps to a valid DMA;
        # its contribution is zeroed by the in-kernel lane mask.
        return (b, 0, jnp.minimum(s * nt_per + t, nt_tot - 1))

    kernel = functools.partial(_dice_kernel, hw=HW, nt_per=nt_per)

    part_shape = jax.ShapeDtypeStruct((B, S, C, 128), jnp.float32)
    out_spec = pl.BlockSpec((None, None, C, 128), lambda b, s, t: (b, s, 0, 0))

    tp, cnt, ps = pl.pallas_call(
        kernel,
        out_shape=(part_shape, part_shape, part_shape),
        grid=(B, S, nt_per),
        in_specs=[
            pl.BlockSpec((None, 1, T), data_idx),   # labels tile
            pl.BlockSpec((None, C, T), data_idx),   # preds tile (native dtype, no upcast)
        ],
        out_specs=(out_spec, out_spec, out_spec),
        compiler_params=pltpu.CompilerParams(
            dimension_semantics=("parallel", "parallel", "arbitrary"),
            vmem_limit_bytes=vmem_limit,
        ),
    )(labels, preds)

    # Tiny finalize in XLA: combine per-core partials + the single cross-lane reduce.
    tp = jnp.sum(tp, axis=(1, 3))      # (B, C)
    cnt = jnp.sum(cnt, axis=(1, 3))    # tp + fn
    ps = jnp.sum(ps, axis=(1, 3))      # tp + fp
    fn = cnt - tp
    fp = ps - tp
    eps = 1e-6
    dice = (tp + eps) / (tp + delta * fn + (1.0 - delta) * fp + eps)
    return jnp.mean(jnp.sum(1.0 - dice, axis=-1) / C)


dice_loss_pallas = jax.jit(_dice_loss_impl, static_argnames=("delta",))


def dice_forward(preds, labels, delta=0.5, aux_weights=(1.0, 0.4, 0.4)):
    """Mirrors Dice.forward (handles the aux-output tuple path)."""
    if isinstance(preds, (tuple, list)):
        return sum(w * dice_loss_pallas(p, labels, delta=delta)
                   for p, w in zip(preds, aux_weights))
    return dice_loss_pallas(preds, labels, delta=delta)


def dice_reference(preds, labels, delta=0.5):
    """Pure-JAX reference mirroring the PyTorch module semantics (f32 accum)."""
    num_classes = preds.shape[1]
    preds = preds.astype(jnp.float32)
    onehot = jax.nn.one_hot(labels, num_classes, dtype=jnp.float32)   # (B,H,W,C)
    onehot = jnp.transpose(onehot, (0, 3, 1, 2))                      # (B,C,H,W)
    tp = jnp.sum(onehot * preds, axis=(2, 3))
    fn = jnp.sum(onehot * (1.0 - preds), axis=(2, 3))
    fp = jnp.sum((1.0 - onehot) * preds, axis=(2, 3))
    dice = (tp + 1e-6) / (tp + delta * fn + (1.0 - delta) * fp + 1e-6)
    return jnp.mean(jnp.sum(1.0 - dice, axis=-1) / num_classes)


if __name__ == "__main__":
    key = jax.random.PRNGKey(0)
    kp, kl, kp2, kq, kr = jax.random.split(key, 5)

    # Case 1: nominal small shape (B=2, C=4, 16x16).
    B, C, H, W = 2, 4, 16, 16
    preds = jax.random.uniform(kp, (B, C, H, W), jnp.float32)
    labels = jax.random.randint(kl, (B, H, W), 0, C, jnp.int32)
    out = jax.block_until_ready(dice_forward(preds, labels))
    ref = jax.block_until_ready(dice_reference(preds, labels))
    np.testing.assert_allclose(np.asarray(out), np.asarray(ref), rtol=1e-5, atol=1e-5)

    # Case 2: aux-output tuple path (Python-weighted sum in the wrapper).
    preds2 = jax.random.uniform(kp2, (B, C, H, W), jnp.float32)
    out_t = jax.block_until_ready(dice_forward((preds, preds2), labels))
    ref_t = jax.block_until_ready(1.0 * dice_reference(preds, labels)
                                  + 0.4 * dice_reference(preds2, labels))
    np.testing.assert_allclose(np.asarray(out_t), np.asarray(ref_t), rtol=1e-5, atol=1e-5)

    # Case 3: B=1 (exercises the 2-way core split), ragged spatial extent
    # (HW = 182, not a multiple of 128 -> in-kernel tail mask) and odd C.
    B2, C2, H2, W2 = 1, 5, 13, 14
    preds3 = jax.random.uniform(kq, (B2, C2, H2, W2), jnp.float32)
    labels3 = jax.random.randint(kr, (B2, H2, W2), 0, C2, jnp.int32)
    out3 = jax.block_until_ready(dice_forward(preds3, labels3, delta=0.7))
    ref3 = jax.block_until_ready(dice_reference(preds3, labels3, delta=0.7))
    np.testing.assert_allclose(np.asarray(out3), np.asarray(ref3), rtol=1e-5, atol=1e-5)

    print("KERNEL_OK")
</pallas_src>

<mosaic_0001>
module attributes {stable_mosaic.version = 11 : i64} {
  func.func @_dice_kernel(%arg0: i32, %arg1: i32, %arg2: i32, %arg3: memref<1x1x256xi32, #tpu.memory_space<vmem>>, %arg4: memref<1x4x256xf32, #tpu.memory_space<vmem>>, %arg5: memref<1x1x4x128xf32, #tpu.memory_space<vmem>>, %arg6: memref<1x1x4x128xf32, #tpu.memory_space<vmem>>, %arg7: memref<1x1x4x128xf32, #tpu.memory_space<vmem>>) attributes {dimension_semantics = [#tpu.dimension_semantics<parallel>, #tpu.dimension_semantics<parallel>, #tpu.dimension_semantics<arbitrary>], iteration_bounds = array<i64: 2, 1, 1>, scalar_prefetch = 0 : i64, scratch_operands = 0 : i64, tpu.core_type = #tpu.core_type<tc>, window_params = [{transform_indices = @transform_0, window_bounds = array<i64: 1, 1, 256>}, {transform_indices = @transform_1, window_bounds = array<i64: 1, 4, 256>}, {transform_indices = @transform_2, window_bounds = array<i64: 1, 1, 4, 128>}, {transform_indices = @transform_3, window_bounds = array<i64: 1, 1, 4, 128>}, {transform_indices = @transform_4, window_bounds = array<i64: 1, 1, 4, 128>}]} {
    %c0_i32 = arith.constant 0 : i32
    %0 = arith.cmpi eq, %arg2, %c0_i32 : i32
    %1 = arith.extui %0 : i1 to i32
    %c0_i32_0 = arith.constant 0 : i32
    %2 = arith.cmpi ne, %1, %c0_i32_0 : i32
    scf.if %2 {
      %cst_27 = arith.constant 0.000000e+00 : f32
      %29 = vector.broadcast %cst_27 : f32 to vector<4x128xf32>
      %c0_28 = arith.constant 0 : index
      %c0_29 = arith.constant 0 : index
      %c0_30 = arith.constant 0 : index
      %c0_31 = arith.constant 0 : index
      %30 = vector.load %arg5[%c0_28, %c0_29, %c0_30, %c0_31] : memref<1x1x4x128xf32, #tpu.memory_space<vmem>>, vector<1x1x4x128xf32>
      %31 = vector.shape_cast %30 : vector<1x1x4x128xf32> to vector<4x128xf32>
      %32 = vector.shape_cast %29 : vector<4x128xf32> to vector<1x1x4x128xf32>
      tpu.vector_store %arg5[%c0_28, %c0_29, %c0_30, %c0_31], %32 {strides = array<i32>} : memref<1x1x4x128xf32, #tpu.memory_space<vmem>>, vector<1x1x4x128xf32>,
      %cst_32 = arith.constant 0.000000e+00 : f32
      %33 = vector.broadcast %cst_32 : f32 to vector<4x128xf32>
      %c0_33 = arith.constant 0 : index
      %c0_34 = arith.constant 0 : index
      %c0_35 = arith.constant 0 : index
      %c0_36 = arith.constant 0 : index
      %34 = vector.load %arg6[%c0_33, %c0_34, %c0_35, %c0_36] : memref<1x1x4x128xf32, #tpu.memory_space<vmem>>, vector<1x1x4x128xf32>
      %35 = vector.shape_cast %34 : vector<1x1x4x128xf32> to vector<4x128xf32>
      %36 = vector.shape_cast %33 : vector<4x128xf32> to vector<1x1x4x128xf32>
      tpu.vector_store %arg6[%c0_33, %c0_34, %c0_35, %c0_36], %36 {strides = array<i32>} : memref<1x1x4x128xf32, #tpu.memory_space<vmem>>, vector<1x1x4x128xf32>,
      %cst_37 = arith.constant 0.000000e+00 : f32
      %37 = vector.broadcast %cst_37 : f32 to vector<4x128xf32>
      %c0_38 = arith.constant 0 : index
      %c0_39 = arith.constant 0 : index
      %c0_40 = arith.constant 0 : index
      %c0_41 = arith.constant 0 : index
      %38 = vector.load %arg7[%c0_38, %c0_39, %c0_40, %c0_41] : memref<1x1x4x128xf32, #tpu.memory_space<vmem>>, vector<1x1x4x128xf32>
      %39 = vector.shape_cast %38 : vector<1x1x4x128xf32> to vector<4x128xf32>
      %40 = vector.shape_cast %37 : vector<4x128xf32> to vector<1x1x4x128xf32>
      tpu.vector_store %arg7[%c0_38, %c0_39, %c0_40, %c0_41], %40 {strides = array<i32>} : memref<1x1x4x128xf32, #tpu.memory_space<vmem>>, vector<1x1x4x128xf32>,
    } else {
    }
    %c1_i32 = arith.constant 1 : i32
    %3 = arith.muli %arg1, %c1_i32 : i32
    %4 = arith.addi %3, %arg2 : i32
    %c256_i32 = arith.constant 256 : i32
    %5 = arith.muli %4, %c256_i32 : i32
    %6 = tpu.iota {dimensions = array<i32: 1>} : vector<1x128xi32>
    %7 = tpu.iota {dimensions = array<i32: 0>} : vector<4x128xi32>
    %cst = arith.constant 0.000000e+00 : f32
    %8 = vector.broadcast %cst : f32 to vector<4x128xf32>
    %c0_i32_1 = arith.constant 0 : i32
    %c2_i32 = arith.constant 2 : i32
    %9 = arith.addi %c0_i32_1, %c2_i32 : i32
    %c1_i32_2 = arith.constant 1 : i32
    %10:3 = scf.for %arg8 = %c0_i32_1 to %9 step %c1_i32_2 iter_args(%arg9 = %8, %arg10 = %8, %arg11 = %8) -> (vector<4x128xf32>, vector<4x128xf32>, vector<4x128xf32>)  : i32 {
      %c128_i32 = arith.constant 128 : i32
      %29 = arith.muli %arg8, %c128_i32 : i32
      %30 = tpu.assume_multiple %29, 128 : i32
      %c0_27 = arith.constant 0 : index
      %c0_28 = arith.constant 0 : index
      %31 = arith.index_cast %30 : i32 to index
      %32 = vector.load %arg4[%c0_27, %c0_28, %31] : memref<1x4x256xf32, #tpu.memory_space<vmem>>, vector<1x4x128xf32>
      %33 = vector.shape_cast %32 : vector<1x4x128xf32> to vector<4x128xf32>
      %c0_29 = arith.constant 0 : index
      %c0_30 = arith.constant 0 : index
      %34 = arith.index_cast %30 : i32 to index
      %35 = vector.load %arg3[%c0_29, %c0_30, %34] : memref<1x1x256xi32, #tpu.memory_space<vmem>>, vector<1x1x128xi32>
      %36 = vector.shape_cast %35 : vector<1x1x128xi32> to vector<1x128xi32>
      %37 = arith.addi %5, %30 : i32
      %38 = vector.broadcast %37 : i32 to vector<1x128xi32>
      %39 = arith.addi %38, %6 : vector<1x128xi32>
      %c256_i32_31 = arith.constant 256 : i32
      %40 = vector.broadcast %c256_i32_31 : i32 to vector<1x128xi32>
      %41 = arith.cmpi slt, %39, %40 : vector<1x128xi32>
      %cst_32 = arith.constant 0.000000e+00 : f32
      %42 = vector.shape_cast %41 : vector<1x128xi1> to vector<1x128xi1>
      %43 = vector.broadcast %42 : vector<1x128xi1> to vector<4x128xi1>
      %44 = vector.broadcast %cst_32 : f32 to vector<4x128xf32>
      %45 = arith.select %43, %33, %44 : vector<4x128xi1>, vector<4x128xf32>
      %46 = vector.broadcast %36 : vector<1x128xi32> to vector<4x128xi32>
      %47 = arith.cmpi eq, %46, %7 : vector<4x128xi32>
      %48 = vector.broadcast %41 : vector<1x128xi1> to vector<4x128xi1>
      %49 = arith.andi %47, %48 : vector<4x128xi1>
      %cst_33 = arith.constant 0.000000e+00 : f32
      %50 = vector.broadcast %cst_33 : f32 to vector<4x128xf32>
      %51 = arith.select %49, %45, %50 : vector<4x128xi1>, vector<4x128xf32>
      %52 = arith.addf %arg9, %51 : vector<4x128xf32>
      %53 = arith.extui %49 : vector<4x128xi1> to vector<4x128xi32>
      %54 = arith.sitofp %53 : vector<4x128xi32> to vector<4x128xf32>
      %55 = arith.addf %arg10, %54 : vector<4x128xf32>
      %56 = arith.addf %arg11, %45 : vector<4x128xf32>
      scf.yield %52, %55, %56 : vector<4x128xf32>, vector<4x128xf32>, vector<4x128xf32>
    }
    %c2_i32_3 = arith.constant 2 : i32
    %c0 = arith.constant 0 : index
    %c0_4 = arith.constant 0 : index
    %c0_5 = arith.constant 0 : index
    %c0_6 = arith.constant 0 : index
    %11 = vector.load %arg5[%c0, %c0_4, %c0_5, %c0_6] : memref<1x1x4x128xf32, #tpu.memory_space<vmem>>, vector<1x1x4x128xf32>
    %12 = vector.shape_cast %11 : vector<1x1x4x128xf32> to vector<4x128xf32>
    %13 = arith.addf %12, %10#0 : vector<4x128xf32>
    %c0_7 = arith.constant 0 : index
    %c0_8 = arith.constant 0 : index
    %c0_9 = arith.constant 0 : index
    %c0_10 = arith.constant 0 : index
    %14 = vector.load %arg5[%c0_7, %c0_8, %c0_9, %c0_10] : memref<1x1x4x128xf32, #tpu.memory_space<vmem>>, vector<1x1x4x128xf32>
    %15 = vector.shape_cast %14 : vector<1x1x4x128xf32> to vector<4x128xf32>
    %16 = vector.shape_cast %13 : vector<4x128xf32> to vector<1x1x4x128xf32>
    tpu.vector_store %arg5[%c0_7, %c0_8, %c0_9, %c0_10], %16 {strides = array<i32>} : memref<1x1x4x128xf32, #tpu.memory_space<vmem>>, vector<1x1x4x128xf32>,
    %c0_11 = arith.constant 0 : index
    %c0_12 = arith.constant 0 : index
    %c0_13 = arith.constant 0 : index
    %c0_14 = arith.constant 0 : index
    %17 = vector.load %arg6[%c0_11, %c0_12, %c0_13, %c0_14] : memref<1x1x4x128xf32, #tpu.memory_space<vmem>>, vector<1x1x4x128xf32>
    %18 = vector.shape_cast %17 : vector<1x1x4x128xf32> to vector<4x128xf32>
    %19 = arith.addf %18, %10#1 : vector<4x128xf32>
    %c0_15 = arith.constant 0 : index
    %c0_16 = arith.constant 0 : index
    %c0_17 = arith.constant 0 : index
    %c0_18 = arith.constant 0 : index
    %20 = vector.load %arg6[%c0_15, %c0_16, %c0_17, %c0_18] : memref<1x1x4x128xf32, #tpu.memory_space<vmem>>, vector<1x1x4x128xf32>
    %21 = vector.shape_cast %20 : vector<1x1x4x128xf32> to vector<4x128xf32>
    %22 = vector.shape_cast %19 : vector<4x128xf32> to vector<1x1x4x128xf32>
    tpu.vector_store %arg6[%c0_15, %c0_16, %c0_17, %c0_18], %22 {strides = array<i32>} : memref<1x1x4x128xf32, #tpu.memory_space<vmem>>, vector<1x1x4x128xf32>,
    %c0_19 = arith.constant 0 : index
    %c0_20 = arith.constant 0 : index
    %c0_21 = arith.constant 0 : index
    %c0_22 = arith.constant 0 : index
    %23 = vector.load %arg7[%c0_19, %c0_20, %c0_21, %c0_22] : memref<1x1x4x128xf32, #tpu.memory_space<vmem>>, vector<1x1x4x128xf32>
    %24 = vector.shape_cast %23 : vector<1x1x4x128xf32> to vector<4x128xf32>
    %25 = arith.addf %24, %10#2 : vector<4x128xf32>
    %c0_23 = arith.constant 0 : index
    %c0_24 = arith.constant 0 : index
    %c0_25 = arith.constant 0 : index
    %c0_26 = arith.constant 0 : index
    %26 = vector.load %arg7[%c0_23, %c0_24, %c0_25, %c0_26] : memref<1x1x4x128xf32, #tpu.memory_space<vmem>>, vector<1x1x4x128xf32>
    %27 = vector.shape_cast %26 : vector<1x1x4x128xf32> to vector<4x128xf32>
    %28 = vector.shape_cast %25 : vector<4x128xf32> to vector<1x1x4x128xf32>
    tpu.vector_store %arg7[%c0_23, %c0_24, %c0_25, %c0_26], %28 {strides = array<i32>} : memref<1x1x4x128xf32, #tpu.memory_space<vmem>>, vector<1x1x4x128xf32>,
    return
  }
  func.func @transform_0(%arg0: i32, %arg1: i32, %arg2: i32) -> (i32, i32, i32) {
    %c1_i32 = arith.constant 1 : i32
    %0 = arith.muli %arg1, %c1_i32 : i32
    %1 = arith.addi %0, %arg2 : i32
    %c0_i32 = arith.constant 0 : i32
    %2 = arith.minsi %1, %c0_i32 : i32
    %c0_i32_0 = arith.constant 0 : i32
    %c0_i32_1 = arith.constant 0 : i32
    return %arg0, %c0_i32_0, %2 : i32, i32, i32
  }
  func.func @transform_1(%arg0: i32, %arg1: i32, %arg2: i32) -> (i32, i32, i32) {
    %c1_i32 = arith.constant 1 : i32
    %0 = arith.muli %arg1, %c1_i32 : i32
    %1 = arith.addi %0, %arg2 : i32
    %c0_i32 = arith.constant 0 : i32
    %2 = arith.minsi %1, %c0_i32 : i32
    %c0_i32_0 = arith.constant 0 : i32
    %c0_i32_1 = arith.constant 0 : i32
    return %arg0, %c0_i32_0, %2 : i32, i32, i32
  }
  func.func @transform_2(%arg0: i32, %arg1: i32, %arg2: i32) -> (i32, i32, i32, i32) {
    %c0_i32 = arith.constant 0 : i32
    %c0_i32_0 = arith.constant 0 : i32
    %c0_i32_1 = arith.constant 0 : i32
    return %arg0, %arg1, %c0_i32, %c0_i32_0 : i32, i32, i32, i32
  }
  func.func @transform_3(%arg0: i32, %arg1: i32, %arg2: i32) -> (i32, i32, i32, i32) {
    %c0_i32 = arith.constant 0 : i32
    %c0_i32_0 = arith.constant 0 : i32
    %c0_i32_1 = arith.constant 0 : i32
    return %arg0, %arg1, %c0_i32, %c0_i32_0 : i32, i32, i32, i32
  }
  func.func @transform_4(%arg0: i32, %arg1: i32, %arg2: i32) -> (i32, i32, i32, i32) {
    %c0_i32 = arith.constant 0 : i32
    %c0_i32_0 = arith.constant 0 : i32
    %c0_i32_1 = arith.constant 0 : i32
    return %arg0, %arg1, %c0_i32, %c0_i32_0 : i32, i32, i32, i32
  }
}

</mosaic_0001>

<bundles_post_ra>
// kernel: _dice_loss_impl.1
= control target key start
LH: loop header
LB: loop body
LE: loop exit
PB: predicated region body
PF: predicated region fallthrough
CT: control target
= control target key end

     0   :  { %s762_s15 = smov 0   ;;  %s764_s16 = smov 0   ;;  %s830_s0 = inlined_call_operand.vmem [shape: s32[2,1,256], index: 0, kind: input, shape index: {}]   ;;  %s831_s1 = inlined_call_operand.vmem [shape: f32[2,4,256], index: 1, kind: input, shape index: {}]   ;;  %s832_s2 = inlined_call_operand.vmem [shape: f32[2,1,4,128], index: 2, kind: output, shape index: {0}]   ;;  %s833_s3 = inlined_call_operand.vmem [shape: f32[2,1,4,128], index: 3, kind: output, shape index: {1}]   ;;  %s834_s4 = inlined_call_operand.vmem [shape: f32[2,1,4,128], index: 4, kind: output, shape index: {2}]  }
   0x1   :  { %s766_s17 = smov 0  }
   0x2 LB: > { %s34_s18 = sadd.s32 1, %s713_s16  ;;  %p607_p0 = scmp.ge.s32.totalorder %s717_s17, 1  ;;  %s717_s17 = sphi %s766_s17, %s15_s17   ;;  %s713_s16 = sphi %s764_s16, %s836_s16   ;;  %s709_s15 = sphi %s762_s15, %s835_s15  }
   0x3   : > { %p36_p1 = scmp.ge.s32.totalorder %s34_s18, 2  ;;  %p239_p2 = scmp.lt.s32.totalorder %s717_s17, 3 }
   0x5   : > { %s838_s18 = smov (%p36_p1, %s34_s18), 0  ;;  %p240_p3 = pnand %p607_p0, %p239_p2 }
   0x6   : > { %p303_p4 = scmp.lt.s32.totalorder (!%p240_p3), %s709_s15, 1  ;;  %s808_s11 = smov (!%p240_p3), 0  }
   0x7   : > { %243 = sbr.rel (%p240_p3) target bundleno = 31 (0x1f), region = 28 }
   0xc   : > { %v360_v0 = vlaneseq  ;;  %s840_s15 = smov (!%p303_p4, %s709_s15), 1  ;;  %v735_v3 = vmov 0.0   ;;  %v719_v4 = vmov 0.0   ;;  %v723_v5 = vmov 0.0  }
   0xd   : > { %s608_s19 = sshll.u32 %s840_s15, 1  ;;  %s620_s20 = sshll.u32 %s840_s15, 3  ;;  %v727_v6 = vmov 0.0  }
   0xe   : > { %v361_v1 = vand.u32 127, %v360_v0  ;;  %v363_v2 = vshrl.u32 %v360_v0, 7  ;;  %s783_s23 = scalar_lea.vmem %s830_s0, %s608_s19  ;;  %s788_s26 = scalar_lea.vmem %s831_s1, %s620_s20 }
   0xf   : > { %s611_s27 = sshll.u32 %s840_s15, 2 }
  0x10   : > { %s793_s30 = scalar_lea.vmem %s832_s2, %s611_s27  ;;  %s798_s7 = scalar_lea.vmem %s833_s3, %s611_s27 }
  0x11   : > { %355 = vst [vmem:[%s793_s30] sm:$0xf] %v735_v3  ;;  %356 = vst [vmem:[%s798_s7] sm:$0xf] %v735_v3  ;;  %s805_s10 = scalar_lea.vmem %s834_s4, %s611_s27 }
  0x12   : > { %357 = vst [vmem:[%s805_s10] sm:$0xf] %v735_v3 }
  0x13 LB: >> { %s614_s12 = sshll.u32 %s733_s11, 7  ;;  %v736_v13 = vmov 0.0   ;;  %s369_s11 = sadd.s32 1, %s733_s11   ;;  %s733_s11 = sphi %s808_s11, %s369_s11   ;;  %v729_v6 = vphi %v727_v6, %v728_v6   ;;  %v725_v5 = vphi %v723_v5, %v724_v5   ;;  %v721_v4 = vphi %v719_v4, %v720_v4  }
  0x14   : >> { %s374_s13 = sshra.s32 %s614_s12, 7  ;;  %v382_v7 = vstv %s614_s12  ;;  %p366_p5 = scmp.ge.s32.totalorder %s369_s11, 2  }
  0x15   : >> { %s615_s14 = sshll.u32 %s374_s13, 2  ;;  %s379_s15 = scalar_lea.vmem %s783_s23, %s374_s13  ;;  %v383_v8 = vadd.s32 %v382_v7, %v361_v1 }
  0x16   : >> { %s377_s19 = scalar_lea.vmem %s788_s26, %s615_s14  ;;  %v616_v9 = vld [vmem:[%s379_s15] ss:$0 sm:$0xff] }
  0x17   : >> { %v378_v10 = vld [vmem:[%s377_s19] sm:$0xf]  ;;  %vm384_vm0 = vcmp.lt.s32.totalorder %v383_v8, 256  ;;  %vm392_vm1 = vcmp.eq.s32.totalorder %v616_v9, %v363_v2 }
  0x18   : >> { %v387_v11 = vsel %vm384_vm0, %v378_v10, 0.0  ;;  %vm393_vm2 = vmand %vm392_vm1, %vm384_vm0  ;;  %368 = sbr.rel (!%p366_p5) target bundleno = 19 (0x13), region = 98  ;;  %v400_v18 = vld [vmem:[%s793_s30] sm:$0xf] (%p366_p5) }
  0x19   : >> { %v394_v12 = vsel %vm393_vm2, %v387_v11, 0.0  ;;  %v617_v14 = vsel %vm393_vm2, 1.0, %v736_v13  ;;  %v399_v15 = vadd.f32 %v721_v4, %v387_v11   ;;  %v403_v19 = vld [vmem:[%s798_s7] sm:$0xf] (%p366_p5) }
  0x1a   : >> { %v395_v16 = vadd.f32 %v729_v6, %v394_v12   ;;  %v398_v17 = vadd.f32 %v725_v5, %v617_v14   ;;  %v406_v20 = vld [vmem:[%s805_s10] sm:$0xf] (%p366_p5) }
  0x1b   : >> { %v720_v4 = vmov %v399_v15   ;;  %v407_v23 = vadd.f32 (%p366_p5), %v406_v20, %v399_v15 }
  0x1c   : >> { %v724_v5 = vmov %v398_v17   ;;  %v728_v6 = vmov %v395_v16   ;;  %v401_v21 = vadd.f32 (%p366_p5), %v400_v18, %v395_v16  ;;  %v404_v22 = vadd.f32 (%p366_p5), %v403_v19, %v398_v17 }
  0x1d   : > { %408 = vst [vmem:[%s805_s10] sm:$0xf] %v407_v23 }
  0x1e   : > { %402 = vst [vmem:[%s793_s30] sm:$0xf] %v401_v21  ;;  %405 = vst [vmem:[%s798_s7] sm:$0xf] %v404_v22 }
  0x1f PF: > { %s15_s17 = sadd.s32 1, %s717_s17   ;;  %s835_s15 = smov %s713_s16 }
  0x20   : > { %p12_p6 = scmp.ge.s32.totalorder %s15_s17, 4   ;;  %s836_s16 = smov %s838_s18 }
  0x22   :  { %14 = sbr.rel (!%p12_p6) target bundleno = 2 (0x2), region = 109 }

</bundles_post_ra>
